<compile_context>
chip_gen: v7x
topology: tpu7x:2x2x1
jax: 0.10.0
libtpu: 0.0.40
codegen_flags: <defaults>
</compile_context>

<pallas_src>
import math
import functools

import jax
import jax.numpy as jnp
from jax import lax
from jax.experimental import pallas as pl
from jax.experimental.pallas import tpu as pltpu


# --------------------------------------------------------------------------- utilities


def _round_up(x, m):
    return ((x + m - 1) // m) * m


def _cdiv(a, b):
    return -(-a // b)


def _default_vmem_limit_bytes():
    """Per-generation VMEM allowance: ~85% of capacity (v5e/v6e ~108 MiB, v7x ~54 MiB)."""
    try:
        info = pltpu.get_tpu_info()
        cap = getattr(info, "vmem_capacity_bytes", None)
    except Exception:
        cap = None
    if not cap:
        return 48 * 1024 * 1024
    return max(32 << 20, min(int(cap * 0.85), cap - (8 << 20)))


def _attn_vmem_bytes(tq, dp, sk, return_attn):
    """VMEM need for the attention call: double-buffered I/O blocks + softmax temps."""
    io_blocks = (tq * dp                    # q tile
                 + 2 * sk * dp              # resident kh, vh
                 + sk                       # mask bias
                 + 2 * (dp * dp + dp)       # wq/bq, wo/bo
                 + tq * dp                  # out tile
                 + (tq * sk if return_attn else 0))
    temporaries = (tq * dp                  # qh
                   + 3 * tq * sk            # scores, p, attn
                   + 2 * tq * dp)           # ctx, projected out
    return 4 * (2 * io_blocks + temporaries) + (4 << 20)   # f32 + Mosaic scratch margin


def _attn_tile_cap(dp, sk, budget, return_attn):
    for tq in (512, 384, 256, 192, 128, 96, 64, 32, 16, 8):
        if _attn_vmem_bytes(tq, dp, sk, return_attn) <= budget:
            return tq
    return 8


def _divisor_tile(total, cap, quantum):
    """Largest multiple of `quantum` that divides `total` and is <= cap."""
    best = quantum
    t = quantum
    while t <= min(cap, total):
        if total % t == 0:
            best = t
        t += quantum
    return best


def _pad3(x, s_to, d_to):
    x = jnp.asarray(x, jnp.float32)
    _, s, d = x.shape
    if s == s_to and d == d_to:
        return x
    return jnp.pad(x, ((0, 0), (0, s_to - s), (0, d_to - d)))


# --------------------------------------------------------------------------- kernels


def _kv_project_kernel(k_ref, v_ref, wk_ref, bk_ref, wv_ref, bv_ref, kh_ref, vh_ref):
    """kh = K @ Wk^T + bk ; vh = V @ Wv^T + bv  for one (row-tile, Dp) block."""
    k = k_ref[0]                                    # (TKr, Dp)
    v = v_ref[0]
    kh_ref[0] = (jnp.dot(k, wk_ref[...], preferred_element_type=jnp.float32)
                 + bk_ref[...]).astype(kh_ref.dtype)
    vh_ref[0] = (jnp.dot(v, wv_ref[...], preferred_element_type=jnp.float32)
                 + bv_ref[...]).astype(vh_ref.dtype)


def _attention_kernel(q_ref, kh_ref, vh_ref, bias_ref, wq_ref, bq_ref, wo_ref, bo_ref,
                      out_ref, *attn_refs, scale):
    q = q_ref[0]                                    # (TQ, Dp)  query tile
    kh = kh_ref[0]                                  # (Sk, Dp)  projected keys (resident)
    vh = vh_ref[0]                                  # (Sk, Dp)  projected values (resident)
    bias = bias_ref[0]                              # (1, Sk)   additive mask: 0 / -1e9

    # Q projection fused here (per-tile anyway); 1/sqrt(d_model) folded into qh.
    qh = (jnp.dot(q, wq_ref[...], preferred_element_type=jnp.float32)
          + bq_ref[...]) * scale

    # scores = qh @ kh^T without materializing a transpose (contract dim 1 with dim 1).
    # (v5e note: verified form; if a hidden vxpose appears, pre-transpose kh instead.)
    scores = lax.dot_general(qh, kh,
                             dimension_numbers=(((1,), (1,)), ((), ())),
                             preferred_element_type=jnp.float32)     # (TQ, Sk)
    scores = scores + bias

    # Row softmax over keys.  Exact divide: attn is returned to the caller and must
    # row-sum to 1 (EUP approx reciprocal was a correctness concern).
    m = jnp.max(scores, axis=-1, keepdims=True)
    p = jnp.exp(scores - m)
    attn = p / jnp.sum(p, axis=-1, keepdims=True)

    ctx = jnp.dot(attn, vh, preferred_element_type=jnp.float32)      # (TQ, Dp)
    out = jnp.dot(ctx, wo_ref[...], preferred_element_type=jnp.float32) + bo_ref[...]

    out_ref[0] = out.astype(out_ref.dtype)
    if attn_refs:
        attn_refs[0][0] = attn.astype(attn_refs[0].dtype)


# --------------------------------------------------------------------------- wrappers


def prepare_params(params):
    """One-time prep of static weights: transpose torch (out,in) -> (in,out), pad to 128."""
    d = params["wq"].shape[0]
    dp = _round_up(max(d, 128), 128)

    def pw(w):
        wt = jnp.asarray(w, jnp.float32).T
        return wt if dp == d else jnp.pad(wt, ((0, dp - d), (0, dp - d)))

    def pb(b):
        bb = jnp.asarray(b, jnp.float32)
        bb = bb if dp == d else jnp.pad(bb, (0, dp - d))
        return bb.reshape(1, dp)

    return {"d_model": d, "Dp": dp,
            "wq": pw(params["wq"]), "bq": pb(params["bq"]),
            "wk": pw(params["wk"]), "bk": pb(params["bk"]),
            "wv": pw(params["wv"]), "bv": pb(params["bv"]),
            "wo": pw(params["wo"]), "bo": pb(params["bo"])}


def attention_forward(q, k, v, mask, prepped, *, return_attn=True, vmem_limit_bytes=None):
    """q: (B, Sq, D); k, v: (B, Skv, D); mask: (B, Skv).  Returns (output, attn)."""
    B, Sq, D = q.shape
    Skv = k.shape[1]
    assert D == prepped["d_model"]
    Dp = prepped["Dp"]
    f32 = jnp.float32

    vmem_limit = vmem_limit_bytes or _default_vmem_limit_bytes()
    budget = int(vmem_limit * 0.8)

    # Key / lane padding: multiple of 128 so scores/attn stores are lane-dense.
    Sk = _round_up(max(Skv, 128), 128)

    # ---------------- 1) K/V projections, hoisted (once per key row, not per q tile) --
    TKr = _divisor_tile(Sk, cap=512, quantum=128)
    n_kr = Sk // TKr
    kp = _pad3(k, Sk, Dp)
    vp = _pad3(v, Sk, Dp)

    row_spec = pl.BlockSpec((1, TKr, Dp), lambda b, r: (b, r, 0))
    w_spec_kv = pl.BlockSpec((Dp, Dp), lambda b, r: (0, 0))
    b_spec_kv = pl.BlockSpec((1, Dp), lambda b, r: (0, 0))

    kh, vh = pl.pallas_call(
        _kv_project_kernel,
        out_shape=(jax.ShapeDtypeStruct((B, Sk, Dp), f32),
                   jax.ShapeDtypeStruct((B, Sk, Dp), f32)),
        grid_spec=pltpu.PrefetchScalarGridSpec(
            num_scalar_prefetch=0,
            grid=(B, n_kr),
            in_specs=[row_spec, row_spec, w_spec_kv, b_spec_kv, w_spec_kv, b_spec_kv],
            out_specs=(row_spec, row_spec),
        ),
        compiler_params=pltpu.CompilerParams(
            dimension_semantics=("parallel", "parallel"),
            vmem_limit_bytes=vmem_limit),
    )(kp, vp, prepped["wk"], prepped["bk"], prepped["wv"], prepped["bv"])

    # ---------------- 2) Attention + output projection ---------------------------------
    # Query tiling: decoupled from key padding; rows only pad to a multiple of 8 per tile.
    TQcap = _attn_tile_cap(Dp, Sk, budget, return_attn)
    n_q = _cdiv(Sq, TQcap)
    TQ = _round_up(_cdiv(Sq, n_q), 8)
    Sqp = TQ * n_q
    qp = _pad3(q, Sqp, Dp)

    # Additive mask bias: 0 keep / -1e9 masked (and -1e9 for padded key columns).
    maskf = jnp.asarray(mask, f32)
    bias = jnp.where(maskf == 0.0, f32(-1e9), f32(0.0))
    if Sk > Skv:
        bias = jnp.pad(bias, ((0, 0), (0, Sk - Skv)), constant_values=-1e9)
    bias = bias.reshape(B, 1, Sk)

    q_spec = pl.BlockSpec((1, TQ, Dp), lambda b, qi: (b, qi, 0))
    kv_spec = pl.BlockSpec((1, Sk, Dp), lambda b, qi: (b, 0, 0))   # resident across qi
    bias_spec = pl.BlockSpec((1, 1, Sk), lambda b, qi: (b, 0, 0))
    w_spec = pl.BlockSpec((Dp, Dp), lambda b, qi: (0, 0))
    b_spec = pl.BlockSpec((1, Dp), lambda b, qi: (0, 0))
    out_spec = pl.BlockSpec((1, TQ, Dp), lambda b, qi: (b, qi, 0))

    if return_attn:
        out_shape = (jax.ShapeDtypeStruct((B, Sqp, Dp), f32),
                     jax.ShapeDtypeStruct((B, Sqp, Sk), f32))
        out_specs = (out_spec, pl.BlockSpec((1, TQ, Sk), lambda b, qi: (b, qi, 0)))
    else:
        out_shape = jax.ShapeDtypeStruct((B, Sqp, Dp), f32)
        out_specs = out_spec

    cost = pl.CostEstimate(
        flops=int(2 * B * (2 * Sqp * Dp * Dp + 2 * Sqp * Sk * Dp)),
        transcendentals=int(B * Sqp * Sk),
        bytes_accessed=int(4 * (B * Sqp * Dp + 2 * B * Sk * Dp + B * Sk
                                + 2 * (Dp * Dp + Dp) + B * Sqp * Dp
                                + (B * Sqp * Sk if return_attn else 0))),
    )

    kernel = functools.partial(_attention_kernel, scale=1.0 / math.sqrt(D))
    results = pl.pallas_call(
        kernel,
        out_shape=out_shape,
        grid_spec=pltpu.PrefetchScalarGridSpec(
            num_scalar_prefetch=0,
            grid=(B, n_q),
            in_specs=[q_spec, kv_spec, kv_spec, bias_spec,
                      w_spec, b_spec,     # Wq^T, bq
                      w_spec, b_spec],    # Wo^T, bo
            out_specs=out_specs,
        ),
        compiler_params=pltpu.CompilerParams(
            dimension_semantics=("parallel", "parallel"),
            vmem_limit_bytes=vmem_limit),
        cost_estimate=cost,
    )(qp, kh, vh, bias, prepped["wq"], prepped["bq"], prepped["wo"], prepped["bo"])

    if return_attn:
        out_p, attn_p = results
        return out_p[:, :Sq, :D], attn_p[:, :Sq, :Skv]
    return results[:, :Sq, :D], None


# --------------------------------------------------------------------------- reference


def _reference(q, k, v, mask, params):
    """Pure-JAX reference at HIGHEST precision (TPU default f32 dots truncate to bf16)."""
    D = params["wq"].shape[0]
    hi = jax.lax.Precision.HIGHEST
    lin = lambda x, w, b: jnp.einsum("bsd,od->bso", x, w, precision=hi) + b
    qh = lin(q, params["wq"], params["bq"])
    kh = lin(k, params["wk"], params["bk"])
    vh = lin(v, params["wv"], params["bv"])
    w = jnp.einsum("bqd,bkd->bqk", qh, kh, precision=hi) / math.sqrt(D)
    w = jnp.where(mask[:, None, :] == 0, -1e9, w)
    a = jax.nn.softmax(w, axis=-1)
    out = jnp.einsum("bqk,bkd->bqd", a, vh, precision=hi)
    out = jnp.einsum("bsd,od->bso", out, params["wo"], precision=hi) + params["bo"]
    return out, a


# --------------------------------------------------------------------------- main


if __name__ == "__main__":
    B, S, D = 2, 8, 32   # small shapes consistent with the module (d_model = D)

    key = jax.random.PRNGKey(0)
    keys = jax.random.split(key, 12)

    q = jax.random.normal(keys[0], (B, S, D), dtype=jnp.float32)
    k = jax.random.normal(keys[1], (B, S, D), dtype=jnp.float32)
    v = jax.random.normal(keys[2], (B, S, D), dtype=jnp.float32)

    # Padding-style mask: batch 0 keeps 6 tokens, batch 1 keeps all 8.
    lengths = jnp.array([6, 8], dtype=jnp.int32)
    mask = (jnp.arange(S)[None, :] < lengths[:, None]).astype(jnp.float32)   # (B, S)

    scale = 1.0 / math.sqrt(D)
    params = {
        "wq": jax.random.uniform(keys[3], (D, D), jnp.float32, -scale, scale),
        "bq": jax.random.uniform(keys[4], (D,), jnp.float32, -scale, scale),
        "wk": jax.random.uniform(keys[5], (D, D), jnp.float32, -scale, scale),
        "bk": jax.random.uniform(keys[6], (D,), jnp.float32, -scale, scale),
        "wv": jax.random.uniform(keys[7], (D, D), jnp.float32, -scale, scale),
        "bv": jax.random.uniform(keys[8], (D,), jnp.float32, -scale, scale),
        "wo": jax.random.uniform(keys[9], (D, D), jnp.float32, -scale, scale),
        "bo": jax.random.uniform(keys[10], (D,), jnp.float32, -scale, scale),
    }

    prepped = prepare_params(params)   # static-weight prep done once, out of the hot path

    out, attn = attention_forward(q, k, v, mask, prepped)
    jax.block_until_ready((out, attn))

    ref_out, ref_attn = _reference(q, k, v, mask, params)

    assert out.shape == (B, S, D) and attn.shape == (B, S, S)
    # Structural check: returned attention rows are exact probability distributions.
    assert jnp.allclose(jnp.sum(attn, axis=-1), 1.0, atol=1e-3)
    # Tolerances leave headroom for MXU pass-precision differences vs the XLA reference.
    assert jnp.allclose(attn, ref_attn, atol=5e-3, rtol=5e-3)
    assert jnp.allclose(out, ref_out, atol=5e-3, rtol=5e-3)

    print("KERNEL_OK")
</pallas_src>

<mosaic_0001>
module attributes {stable_mosaic.version = 11 : i64} {
  func.func @_kv_project_kernel(%arg0: i32, %arg1: i32, %arg2: memref<1x128x128xf32, #tpu.memory_space<vmem>>, %arg3: memref<1x128x128xf32, #tpu.memory_space<vmem>>, %arg4: memref<128x128xf32, #tpu.memory_space<vmem>>, %arg5: memref<1x128xf32, #tpu.memory_space<vmem>>, %arg6: memref<128x128xf32, #tpu.memory_space<vmem>>, %arg7: memref<1x128xf32, #tpu.memory_space<vmem>>, %arg8: memref<1x128x128xf32, #tpu.memory_space<vmem>>, %arg9: memref<1x128x128xf32, #tpu.memory_space<vmem>>) attributes {dimension_semantics = [#tpu.dimension_semantics<parallel>, #tpu.dimension_semantics<parallel>], iteration_bounds = array<i64: 2, 1>, scalar_prefetch = 0 : i64, scratch_operands = 0 : i64, tpu.core_type = #tpu.core_type<tc>, window_params = [{transform_indices = @transform_0, window_bounds = array<i64: 1, 128, 128>}, {transform_indices = @transform_1, window_bounds = array<i64: 1, 128, 128>}, {pipeline_mode = #tpu.pipeline_mode<synchronous>, transform_indices = @transform_2, window_bounds = array<i64: 128, 128>}, {pipeline_mode = #tpu.pipeline_mode<synchronous>, transform_indices = @transform_3, window_bounds = array<i64: 1, 128>}, {pipeline_mode = #tpu.pipeline_mode<synchronous>, transform_indices = @transform_4, window_bounds = array<i64: 128, 128>}, {pipeline_mode = #tpu.pipeline_mode<synchronous>, transform_indices = @transform_5, window_bounds = array<i64: 1, 128>}, {transform_indices = @transform_6, window_bounds = array<i64: 1, 128, 128>}, {transform_indices = @transform_7, window_bounds = array<i64: 1, 128, 128>}]} {
    %c0 = arith.constant 0 : index
    %c0_0 = arith.constant 0 : index
    %c0_1 = arith.constant 0 : index
    %0 = vector.load %arg2[%c0, %c0_0, %c0_1] : memref<1x128x128xf32, #tpu.memory_space<vmem>>, vector<1x128x128xf32>
    %1 = vector.shape_cast %0 : vector<1x128x128xf32> to vector<128x128xf32>
    %c0_2 = arith.constant 0 : index
    %c0_3 = arith.constant 0 : index
    %c0_4 = arith.constant 0 : index
    %2 = vector.load %arg3[%c0_2, %c0_3, %c0_4] : memref<1x128x128xf32, #tpu.memory_space<vmem>>, vector<1x128x128xf32>
    %3 = vector.shape_cast %2 : vector<1x128x128xf32> to vector<128x128xf32>
    %c0_5 = arith.constant 0 : index
    %c0_6 = arith.constant 0 : index
    %4 = vector.load %arg4[%c0_5, %c0_6] : memref<128x128xf32, #tpu.memory_space<vmem>>, vector<128x128xf32>
    %cst = arith.constant dense<0.000000e+00> : vector<128x128xf32>
    %5 = tpu.matmul %1, %4, %cst {dimension_numbers = #tpu.dot_dimension_numbers<[1], [0], [0], [1], [0, 0, 1, 1], [], []>} : vector<128x128xf32>, vector<128x128xf32>, vector<128x128xf32> -> vector<128x128xf32>
    %c0_7 = arith.constant 0 : index
    %c0_8 = arith.constant 0 : index
    %6 = vector.load %arg5[%c0_7, %c0_8] : memref<1x128xf32, #tpu.memory_space<vmem>>, vector<1x128xf32>
    %7 = vector.broadcast %6 : vector<1x128xf32> to vector<128x128xf32>
    %8 = arith.addf %5, %7 : vector<128x128xf32>
    %c0_9 = arith.constant 0 : index
    %c0_10 = arith.constant 0 : index
    %c0_11 = arith.constant 0 : index
    %9 = vector.load %arg8[%c0_9, %c0_10, %c0_11] : memref<1x128x128xf32, #tpu.memory_space<vmem>>, vector<1x128x128xf32>
    %10 = vector.shape_cast %9 : vector<1x128x128xf32> to vector<128x128xf32>
    %11 = vector.shape_cast %8 : vector<128x128xf32> to vector<1x128x128xf32>
    tpu.vector_store %arg8[%c0_9, %c0_10, %c0_11], %11 {strides = array<i32>} : memref<1x128x128xf32, #tpu.memory_space<vmem>>, vector<1x128x128xf32>,
    %c0_12 = arith.constant 0 : index
    %c0_13 = arith.constant 0 : index
    %12 = vector.load %arg6[%c0_12, %c0_13] : memref<128x128xf32, #tpu.memory_space<vmem>>, vector<128x128xf32>
    %cst_14 = arith.constant dense<0.000000e+00> : vector<128x128xf32>
    %13 = tpu.matmul %3, %12, %cst_14 {dimension_numbers = #tpu.dot_dimension_numbers<[1], [0], [0], [1], [0, 0, 1, 1], [], []>} : vector<128x128xf32>, vector<128x128xf32>, vector<128x128xf32> -> vector<128x128xf32>
    %c0_15 = arith.constant 0 : index
    %c0_16 = arith.constant 0 : index
    %14 = vector.load %arg7[%c0_15, %c0_16] : memref<1x128xf32, #tpu.memory_space<vmem>>, vector<1x128xf32>
    %15 = vector.broadcast %14 : vector<1x128xf32> to vector<128x128xf32>
    %16 = arith.addf %13, %15 : vector<128x128xf32>
    %c0_17 = arith.constant 0 : index
    %c0_18 = arith.constant 0 : index
    %c0_19 = arith.constant 0 : index
    %17 = vector.load %arg9[%c0_17, %c0_18, %c0_19] : memref<1x128x128xf32, #tpu.memory_space<vmem>>, vector<1x128x128xf32>
    %18 = vector.shape_cast %17 : vector<1x128x128xf32> to vector<128x128xf32>
    %19 = vector.shape_cast %16 : vector<128x128xf32> to vector<1x128x128xf32>
    tpu.vector_store %arg9[%c0_17, %c0_18, %c0_19], %19 {strides = array<i32>} : memref<1x128x128xf32, #tpu.memory_space<vmem>>, vector<1x128x128xf32>,
    return
  }
  func.func @transform_0(%arg0: i32, %arg1: i32) -> (i32, i32, i32) {
    %c0_i32 = arith.constant 0 : i32
    %c0_i32_0 = arith.constant 0 : i32
    return %arg0, %arg1, %c0_i32 : i32, i32, i32
  }
  func.func @transform_1(%arg0: i32, %arg1: i32) -> (i32, i32, i32) {
    %c0_i32 = arith.constant 0 : i32
    %c0_i32_0 = arith.constant 0 : i32
    return %arg0, %arg1, %c0_i32 : i32, i32, i32
  }
  func.func @transform_2(%arg0: i32, %arg1: i32) -> (i32, i32) {
    %c0_i32 = arith.constant 0 : i32
    %c0_i32_0 = arith.constant 0 : i32
    %c0_i32_1 = arith.constant 0 : i32
    return %c0_i32, %c0_i32_0 : i32, i32
  }
  func.func @transform_3(%arg0: i32, %arg1: i32) -> (i32, i32) {
    %c0_i32 = arith.constant 0 : i32
    %c0_i32_0 = arith.constant 0 : i32
    %c0_i32_1 = arith.constant 0 : i32
    return %c0_i32, %c0_i32_0 : i32, i32
  }
  func.func @transform_4(%arg0: i32, %arg1: i32) -> (i32, i32) {
    %c0_i32 = arith.constant 0 : i32
    %c0_i32_0 = arith.constant 0 : i32
    %c0_i32_1 = arith.constant 0 : i32
    return %c0_i32, %c0_i32_0 : i32, i32
  }
  func.func @transform_5(%arg0: i32, %arg1: i32) -> (i32, i32) {
    %c0_i32 = arith.constant 0 : i32
    %c0_i32_0 = arith.constant 0 : i32
    %c0_i32_1 = arith.constant 0 : i32
    return %c0_i32, %c0_i32_0 : i32, i32
  }
  func.func @transform_6(%arg0: i32, %arg1: i32) -> (i32, i32, i32) {
    %c0_i32 = arith.constant 0 : i32
    %c0_i32_0 = arith.constant 0 : i32
    return %arg0, %arg1, %c0_i32 : i32, i32, i32
  }
  func.func @transform_7(%arg0: i32, %arg1: i32) -> (i32, i32, i32) {
    %c0_i32 = arith.constant 0 : i32
    %c0_i32_0 = arith.constant 0 : i32
    return %arg0, %arg1, %c0_i32 : i32, i32, i32
  }
}

</mosaic_0001>

<bundles_post_ra>
// kernel: tpu_custom_call.1
= control target key start
LH: loop header
LB: loop body
LE: loop exit
PB: predicated region body
PF: predicated region fallthrough
CT: control target
= control target key end

     0   :  { %s2144_s0 = inlined_call_operand.hbm [shape: f32[2,128,128], index: 0, kind: input, shape index: {}]   ;;  %s2145_s1 = inlined_call_operand.hbm [shape: f32[2,128,128], index: 1, kind: input, shape index: {}]   ;;  %s2146_s2 = inlined_call_operand.hbm [shape: f32[128,128], index: 2, kind: input, shape index: {}]   ;;  %s2147_s3 = inlined_call_operand.vmem [shape: f32[1,128], index: 3, kind: input, shape index: {}]   ;;  %s2148_s4 = inlined_call_operand.hbm [shape: f32[128,128], index: 4, kind: input, shape index: {}]   ;;  %s2149_s5 = inlined_call_operand.vmem [shape: f32[1,128], index: 5, kind: input, shape index: {}]   ;;  %s2150_s6 = inlined_call_operand.hbm [shape: f32[2,128,128], index: 6, kind: output, shape index: {0}]   ;;  %s2151_s7 = inlined_call_operand.hbm [shape: f32[2,128,128], index: 7, kind: output, shape index: {1}]  }
   0x1   :  { %2163 = sst [smem:[#allocation24_spill]] %s2144_s0 }
   0x2   :  { %2164 = sst [smem:[#allocation25_spill]] %s2146_s2 }
   0x3   :  { %2165 = sst [smem:[#allocation26_spill]] %s2148_s4 }
   0x4   :  { %13 = vsyncpa [#allocation3], 0 }
   0x5   :  { %15 = vsyncpa [#allocation3 + $0x1], 0 }
   0x6   :  { %16 = vsyncpa [#allocation6], 0 }
   0x7   :  { %18 = vsyncpa [#allocation6 + $0x1], 0 }
   0x8   :  { %19 = vsyncpa [#allocation9], 0 }
   0x9   :  { %20 = vsyncpa [#allocation4], 0 }
   0xa   :  { %22 = vsyncpa [#allocation4 + $0x1], 0 }
   0xb   :  { %23 = vsyncpa [#allocation12], 0 }
   0xc   :  { %25 = vsyncpa [#allocation12 + $0x1], 0  ;;  %s1675_s24 = smov 0   ;;  %s1677_s25 = smov 0  }
   0xd   :  { %s1679_s26 = smov 0   ;;  %s1681_s27 = smov 0  }
   0xe   :  { %s1683_s28 = smov 0   ;;  %s1685_s29 = smov 0  }
   0xf LB: > { %2166 = sst [smem:[#allocation19_spill]] %s1611_s26  ;;  %s1706_s30 = sadd.s32 4294967295, %s1623_s29   ;;  %s1623_s29 = sphi %s1685_s29, %s31_s29   ;;  %s1619_s28 = sphi %s1683_s28, %s2195_s28   ;;  %s1615_s27 = sphi %s1681_s27, %s2199_s27   ;;  %s1611_s26 = sphi %s1679_s26, %s2198_s26   ;;  %s1607_s25 = sphi %s1677_s25, %s2197_s25   ;;  %s1603_s24 = sphi %s1675_s24, %s2196_s24  }
  0x10   : > { %2167 = sst [smem:[#allocation20_spill]] %s1619_s28  ;;  %s1012_s8 = sadd.s32 4294967294, %s1623_s29  }
  0x11   : > { %p65_p0 = scmp.ne.s32.totalorder %s1607_s25, %s1603_s24  ;;  %p2152_p1 = scmp.eq.s32.totalorder %s1706_s30, 0 }
  0x12   : > { %p209_p3 = scmp.eq.s32.totalorder %s1012_s8, 1  ;;  %p1013_p5 = scmp.ge.s32.totalorder %s1623_s29, 1 }
  0x13   : > { %p1715_p4 = por %p2152_p1, %p65_p0  ;;  %p244_p7 = scmp.lt.s32.totalorder %s1623_s29, 3 }
  0x14   : > { %p1720_p6 = por %p209_p3, %p65_p0  ;;  %s1625_s12 = smov [#allocation7]  }
  0x15   : > { %s2168_s9 = scalar_select %p1715_p4, 1, 0 }
  0x16   : > { %s2169_s10 = scalar_select %p1720_p6, 1, 0 }
  0x17   : > { %p1725_p8 = pnand %p1013_p5, %p244_p7  ;;  %s256_s13 = sshll.u32 %s1625_s12, 4  ;;  %s1729_s13 = int_to_ptr.vmem [resolvable:$true] %s256_s13 }
  0x18   : > { %2170 = sst [smem:[#allocation21_spill]] %s2169_s10  ;;  %s1626_s15 = smov [#allocation8]  }
  0x19   : > { %p1300_p9 = pneg %p1725_p8  ;;  %s272_s16 = sshll.u32 %s1626_s15, 4  ;;  %s1740_s16 = int_to_ptr.vmem [resolvable:$true] %s272_s16 }
  0x1a   : > { %s2173_s2 = sld [smem:[#allocation25_spill]] }
  0x1b   : > { %p1736_p11 = pnand %p1300_p9, %p2152_p1 }
  0x1d   : > { %p1383_p13 = pneg %p1736_p11 }
  0x20   : > { %s1381_s19 = scalar_lea.hbm %s2173_s2, 2048 }
  0x21   : > { %p1382_p12 = scmp.ne.s32.totalorder %s2173_s2, %s1381_s19  ;;  %p1388_p5 = scmp.lt.u32.totalorder %s1381_s19, %s2173_s2 }
  0x23   : > { %p1384_p0 = pnand %p1383_p13, %p1382_p12 }
  0x25   : > { %p1385_p3 = pneg %p1384_p0 }
  0x27   : > { %p1390_p7 = pnand %p1388_p5, %p1385_p3 }
  0x29   : > { %1393 = shalt.err (!%p1390_p7)
}
  0x2a   : > { %s1394_s8 = scalar_lea.vmem %s1729_s13, 2048  ;;  %p1402_p2 = scmp.lt.s32.totalorder %s1729_s13, %s1729_s13 }
  0x2b   : > { %p1395_p9 = scmp.ne.s32.totalorder %s1729_s13, %s1394_s8  ;;  %p1403_p12 = scmp.lt.s32.totalorder %s1394_s8, %s1394_s8 }
  0x2d   : > { %p1397_p10 = pnand %p1395_p9, %p1383_p13  ;;  %p1404_p0 = por %p1403_p12, %p1402_p2 }
  0x2f   : > { %p1398_p1 = pneg %p1397_p10 }
  0x31   : > { %p1405_p6 = pnand %p1404_p0, %p1398_p1 }
  0x33   : > { %1408 = shalt.err (!%p1405_p6)
}
  0x34   : > { %s2154_s12 = smov 128   ;;  %s2156_s15 = smov 8  }
  0x35   : > { %1303 = dma.hbm_to_vmem [thread:$0]  (!%p1736_p11), %s2173_s2, 2048, %s1729_s13, [#allocation6], %s2154_s12, %s2154_s12, %s2156_s15  }
  0x36   : > { %s2174_s4 = sld [smem:[#allocation26_spill]] }
  0x3c   : > { %s1409_s21 = scalar_lea.hbm %s2174_s4, 2048 }
  0x3d   : > { %p1410_p1 = scmp.ne.s32.totalorder %s2174_s4, %s1409_s21  ;;  %p1416_p10 = scmp.lt.u32.totalorder %s1409_s21, %s2174_s4 }
  0x3f   : > { %p1412_p2 = pnand %p1410_p1, %p1383_p13 }
  0x41   : > { %p1413_p6 = pneg %p1412_p2 }
  0x43   : > { %p1418_p3 = pnand %p1416_p10, %p1413_p6 }
  0x45   : > { %1421 = shalt.err (!%p1418_p3)
}
  0x46   : > { %s1422_s13 = scalar_lea.vmem %s1740_s16, 2048  ;;  %p1430_p12 = scmp.lt.s32.totalorder %s1740_s16, %s1740_s16 }
  0x47   : > { %p1423_p5 = scmp.ne.s32.totalorder %s1740_s16, %s1422_s13  ;;  %p1431_p0 = scmp.lt.s32.totalorder %s1422_s13, %s1422_s13 }
  0x49   : > { %p1425_p7 = pnand %p1423_p5, %p1383_p13  ;;  %p1432_p1 = por %p1431_p0, %p1430_p12 }
  0x4b   : > { %p1426_p9 = pneg %p1425_p7 }
  0x4d   : > { %p1433_p2 = pnand %p1432_p1, %p1426_p9 }
  0x4f   : > { %1436 = shalt.err (!%p1433_p2)
}
  0x50   : > { %1306 = dma.hbm_to_vmem [thread:$0]  (!%p1736_p11), %s2174_s4, 2048, %s1740_s16, [#allocation9], %s2154_s12, %s2154_s12, %s2156_s15  }
  0x51   : > { %s43_s14 = sadd.s32 1, %s1619_s28  ;;  %s52_s18 = sadd.s32 1, %s1611_s26 }
  0x52   : > { %p45_p13 = scmp.ge.s32.totalorder %s43_s14, 2  ;;  %p59_p6 = scmp.ne.s32.totalorder %s1611_s26, %s1607_s25 }
  0x53   : > { %p60_p10 = scmp.eq.s32.totalorder %s1623_s29, 0  ;;  %p1323_p3 = scmp.lt.s32.totalorder %s1623_s29, 2 }
  0x54   : > { %s2201_s14 = smov (%p45_p13, %s43_s14), 0  ;;  %p2176_p7 = scmp.eq.s32.totalorder %s1706_s30, 1 }
  0x55   : > { %2175 = sst [smem:[#allocation22_spill]] %s2201_s14  ;;  %p61_p5 = por %p60_p10, %p59_p6 }
  0x56   : > { %p1810_p9 = por %p2176_p7, %p59_p6  ;;  %s47_s20 = ssub.s32 %s1619_s28, %s2201_s14 }
  0x57   : > { %s289_s21 = sand.u32 1, %s1611_s26   ;;  %p50_p12 = scmp.eq.s32.totalorder %s47_s20, 0 }
  0x58   : > { %s2177_s19 = scalar_select %p1810_p9, 1, 0 }
  0x59   : > { %s1817_s16 = sshll.u32 %s289_s21, 7  ;;  %s1040_s22 = sshll.u32 %s1619_s28, 11 }
  0x5a   : > { %s1821_s23 = scalar_select %p50_p12, %s1611_s26, %s52_s18  }
  0x5b   : > { %s2179_s0 = sld [smem:[#allocation24_spill]]  ;;  %s293_s17 = scalar_lea.vmem [#allocation2], %s1817_s16 }
  0x5c   : > { %2178 = sst [smem:[#allocation23_spill]] %s1821_s23  ;;  %s302_s12 = sshll.u32 %s293_s17, 4  ;;  %s1835_s12 = int_to_ptr.vmem [resolvable:$true] %s302_s12 }
  0x5d   : > { %p1831_p11 = pnand %p1323_p3, %p61_p5  ;;  %s1840_s8 = scalar_lea.hbm %s2145_s1, %s1040_s22 }
  0x5e   : > { %s1842_s13 = scalar_lea.sflag [#allocation3], %s289_s21 }
  0x5f   : > { %p1439_p1 = pneg %p1831_p11 }
  0x61   : > { %s1826_s10 = scalar_lea.hbm %s2179_s0, %s1040_s22  ;;  %s1442_s14 = scalar_lea.hbm %s2179_s0, 4096 }
  0x62   : > { %s1437_s2 = scalar_lea.hbm %s1826_s10, 2048  ;;  %p1443_p6 = scmp.lt.u32.totalorder %s1826_s10, %s2179_s0 }
  0x63   : > { %p1438_p0 = scmp.ne.s32.totalorder %s1826_s10, %s1437_s2  ;;  %p1444_p10 = scmp.lt.u32.totalorder %s1442_s14, %s1437_s2 }
  0x64   : > { %p1446_p5 = scmp.lt.u32.totalorder %s1437_s2, %s1826_s10 }
  0x65   : > { %p1440_p2 = pnand %p1439_p1, %p1438_p0  ;;  %p1445_p3 = por %p1444_p10, %p1443_p6 }
  0x67   : > { %p1441_p13 = pneg %p1440_p2  ;;  %p1447_p7 = por %p1446_p5, %p1445_p3 }
  0x69   : > { %p1448_p12 = pnand %p1447_p7, %p1441_p13 }
  0x6b   : > { %1451 = shalt.err (!%p1448_p12)
}
  0x6c   : > { %s1452_s15 = scalar_lea.vmem %s1835_s12, 2048  ;;  %s1629_s4 = smov [#allocation2]  }
  0x6d   : > { %p1453_p0 = scmp.ne.s32.totalorder %s1835_s12, %s1452_s15  ;;  %s1457_s21 = sshll.u32 %s1629_s4, 4  ;;  %s1458_s21 = int_to_ptr.vmem [resolvable:$false] %s1457_s21 }
  0x6e   : > { %s1459_s28 = scalar_lea.vmem %s1458_s21, 4096  ;;  %p1460_p4 = scmp.lt.s32.totalorder %s1835_s12, %s1458_s21 }
  0x6f   : > { %p1455_p2 = pnand %p1453_p0, %p1439_p1  ;;  %p1461_p6 = scmp.lt.s32.totalorder %s1459_s28, %s1452_s15 }
  0x71   : > { %p1456_p9 = pneg %p1455_p2  ;;  %p1462_p10 = por %p1461_p6, %p1460_p4 }
  0x73   : > { %p1463_p3 = pnand %p1462_p10, %p1456_p9 }
  0x75   : > { %1466 = shalt.err (!%p1463_p3)
}
  0x76   : > { %s2181_s2 = smov 8   ;;  %s2182_s14 = smov 128  }
  0x77   : > { %1310 = dma.hbm_to_vmem [thread:$0]  (!%p1831_p11), %s1826_s10, 2048, %s1835_s12, %s1842_s13, %s2182_s14, %s2182_s14, %s2181_s2  }
  0x78   : > { %s316_s22 = scalar_lea.vmem [#allocation5], %s1817_s16  ;;  %s312_s18 = sand.u32 1, %s1623_s29  }
  0x79   : > { %s325_s23 = sshll.u32 %s316_s22, 4  ;;  %s1877_s17 = scalar_lea.sflag [#allocation6], %s312_s18  ;;  %s1875_s23 = int_to_ptr.vmem [resolvable:$true] %s325_s23 }
  0x7a   : > { %s1467_s15 = scalar_lea.hbm %s1840_s8, 2048  ;;  %s1472_s28 = scalar_lea.hbm %s2145_s1, 4096 }
  0x7b   : > { %p1468_p4 = scmp.ne.s32.totalorder %s1840_s8, %s1467_s15  ;;  %p1473_p5 = scmp.lt.u32.totalorder %s1840_s8, %s2145_s1 }
  0x7c   : > { %p1474_p7 = scmp.lt.u32.totalorder %s1472_s28, %s1467_s15  ;;  %p1476_p0 = scmp.lt.u32.totalorder %s1467_s15, %s1840_s8 }
  0x7d   : > { %p1470_p9 = pnand %p1468_p4, %p1439_p1 }
  0x7e   : > { %p1475_p12 = por %p1474_p7, %p1473_p5 }
  0x7f   : > { %p1471_p13 = pneg %p1470_p9 }
  0x80   : > { %p1477_p2 = por %p1476_p0, %p1475_p12 }
  0x82   : > { %p1478_p6 = pnand %p1477_p2, %p1471_p13 }
  0x84   : > { %1481 = shalt.err (!%p1478_p6)
}
  0x85   : > { %s1482_s12 = scalar_lea.vmem %s1875_s23, 2048  ;;  %s1630_s16 = smov [#allocation5]  }
  0x86   : > { %p1483_p10 = scmp.ne.s32.totalorder %s1875_s23, %s1482_s12  ;;  %s1487_s10 = sshll.u32 %s1630_s16, 4  ;;  %s1488_s10 = int_to_ptr.vmem [resolvable:$false] %s1487_s10 }
  0x87   : > { %s1489_s0 = scalar_lea.vmem %s1488_s10, 4096  ;;  %p1490_p9 = scmp.lt.s32.totalorder %s1875_s23, %s1488_s10 }
  0x88   : > { %p1485_p3 = pnand %p1483_p10, %p1439_p1  ;;  %p1491_p5 = scmp.lt.s32.totalorder %s1489_s0, %s1482_s12 }
  0x8a   : > { %p1486_p4 = pneg %p1485_p3  ;;  %p1492_p7 = por %p1491_p5, %p1490_p9 }
  0x8c   : > { %p1493_p12 = pnand %p1492_p7, %p1486_p4 }
  0x8e   : > { %1496 = shalt.err (!%p1493_p12)
}
  0x8f   : > { %1313 = dma.hbm_to_vmem [thread:$0]  (!%p1831_p11), %s1840_s8, 2048, %s1875_s23, %s1877_s17, %s2182_s14, %s2182_s14, %s2181_s2  }
  0x90   : > { %337 = sbr.rel (%p1725_p8) target bundleno = 478 (0x1de), region = 44  ;;  %s1909_s26 = sand.u32 (!%p1725_p8), 1, %s1607_s25  }
  0x91   : > { %s1912_s13 = sshll.u32 (!%p1725_p8), %s1909_s26, 7  ;;  %s340_s20 = scalar_lea.sflag (!%p1725_p8), [#allocation3], %s1909_s26 }
  0x92   : > { %s1916_s22 = scalar_lea.vmem (!%p1725_p8), [#allocation2], %s1912_s13  ;;  %p2183_p1 = scmp.ne.s32.totalorder (!%p1725_p8), %s2168_s9, 0 }
  0x97   : > { %1578 = dma.done.wait (%p2183_p1), %s340_s20, 2048  }
  0x98   : > { %1580 = vsyncadd (%p2183_p1), %s340_s20, 4294965248  ;;  %s348_s11 = sand.u32 1, %s1706_s30   ;;  %s1924_s2 = scalar_lea.vmem [#allocation5], %s1912_s13 }
  0x99   : > { %s349_s8 = scalar_lea.sflag [#allocation6], %s348_s11 }
  0x9a   : > { %1582 = dma.done.wait (%p2183_p1), %s349_s8, 2048  }
  0x9b   : > { %1584 = vsyncadd (%p2183_p1), %s349_s8, 4294965248  ;;  %p2184_p8 = scmp.eq.s32.totalorder %s1706_s30, 0 }
  0x9d   : > { %1586 = dma.done.wait (%p2184_p8), [#allocation6], 2048   ;;  %p2185_p11 = pmov %p2184_p8 }
  0x9e   : > { %p2186_p13 = pmov %p2184_p8 }
  0x9f   : > { %1588 = vsyncadd (%p2185_p11), [#allocation6], 4294965248 }
  0xa0   : > { %1590 = dma.done.wait (%p2186_p13), [#allocation9], 2048   ;;  %p2187_p0 = pmov %p2184_p8 }
  0xa1   : > { %v437_v0 = vld [vmem:[#allocation7] sm:$0xff]  ;;  %v438_v1 = vld [vmem:[#allocation7 + $0x8] sm:$0xff]  ;;  %v439_v5 = vld [vmem:[#allocation7 + $0x10] sm:$0xff]  ;;  %s1984_s18 = scalar_lea.vmem [#allocation10], %s1912_s13  ;;  %s1989_s17 = scalar_lea.vmem [#allocation11], %s1912_s13 }
  0xa2   : > { %1592 = vsyncadd (%p2187_p0), [#allocation9], 4294965248  ;;  %v621_v2 = vld [vmem:[#allocation8] sm:$0xff]  ;;  %v1220_v3 = vpack.c.bf16 %v438_v1, %v437_v0  ;;  %v622_v4 = vld [vmem:[#allocation8 + $0x8] sm:$0xff]  ;;  %s1042_s15 = sshll.u32 %s1615_s27, 11  ;;  %s826_s4 = sshll.u32 %s1984_s18, 4  ;;  %s2051_s4 = int_to_ptr.vmem [resolvable:$true] %s826_s4 }
  0xa3   : > { %v440_v6 = vld [vmem:[#allocation7 + $0x18] sm:$0xff]  ;;  %v1252_v7 = vpack.c.bf16 %v622_v4, %v621_v2  ;;  %v623_v9 = vld [vmem:[#allocation8 + $0x10] sm:$0xff]  ;;  %v441_v11 = vld [vmem:[#allocation7 + $0x20] sm:$0xff]  ;;  %s2046_s12 = scalar_lea.hbm %s2150_s6, %s1042_s15  ;;  %s844_s27 = sshll.u32 %s1989_s17, 4  ;;  %s2062_s27 = int_to_ptr.vmem [resolvable:$true] %s844_s27 }
  0xa4   : > { %v1224_v8 = vpack.c.bf16 %v440_v6, %v439_v5  ;;  %v624_v10 = vld [vmem:[#allocation8 + $0x18] sm:$0xff]  ;;  %1221 = vmatprep.subr.bf16.mxu0 %v1220_v3  ;;  %v442_v13 = vld [vmem:[#allocation7 + $0x28] sm:$0xff]  ;;  %v625_v14 = vld [vmem:[#allocation8 + $0x20] sm:$0xff]  ;;  %s2060_s0 = scalar_lea.hbm %s2151_s7, %s1042_s15  ;;  %s806_s13 = scalar_lea.sflag [#allocation4], %s1909_s26 }
  0xa5   : > { %v1256_v12 = vpack.c.bf16 %v624_v10, %v623_v9  ;;  %v626_v15 = vld [vmem:[#allocation8 + $0x28] sm:$0xff]  ;;  %1253 = vmatprep.subr.bf16.mxu1 %v1252_v7  ;;  %1223 = vmatpush3.bf16.msra.mxu0 %v1220_v3  ;;  %v1228_v16 = vpack.c.bf16 %v442_v13, %v441_v11  ;;  %v443_v18 = vld [vmem:[#allocation7 + $0x30] sm:$0xff]  ;;  %v444_v19 = vld [vmem:[#allocation7 + $0x38] sm:$0xff]  ;;  %s1497_s20 = scalar_lea.vmem %s2051_s4, 2048  ;;  %p2188_p6 = scmp.ne.s32.totalorder %s2177_s19, 0 }
  0xa6   : > { %1255 = vmatpush3.bf16.msra.mxu1 %v1252_v7  ;;  %1225 = vmatprep.subr.bf16.mxu0 %v1224_v8  ;;  %v1260_v17 = vpack.c.bf16 %v626_v15, %v625_v14  ;;  %v627_v20 = vld [vmem:[#allocation8 + $0x30] sm:$0xff]  ;;  %v628_v21 = vld [vmem:[#allocation8 + $0x38] sm:$0xff]  ;;  %v1232_v22 = vpack.c.bf16 %v444_v19, %v443_v18  ;;  %v445_v24 = vld [vmem:[#allocation7 + $0x40] sm:$0xff]  ;;  %p1498_p2 = scmp.ne.s32.totalorder %s2051_s4, %s1497_s20 }
  0xa7   : > { %1257 = vmatprep.subr.bf16.mxu1 %v1256_v12  ;;  %v1264_v23 = vpack.c.bf16 %v628_v21, %v627_v20  ;;  %v446_v25 = vld [vmem:[#allocation7 + $0x48] sm:$0xff]  ;;  %v405_v26 = vld [vmem:[%s1916_s22] sm:$0xff]  ;;  %v447_v32 = vld [vmem:[#allocation7 + $0x50] sm:$0xff] }
  0xa8   : > { %v629_v27 = vld [vmem:[#allocation8 + $0x40] sm:$0xff]  ;;  %v630_v28 = vld [vmem:[#allocation8 + $0x48] sm:$0xff]  ;;  %1140 = vmatprep.mubr.f32.mxu0 %v405_v26  ;;  %v1236_v30 = vpack.c.bf16 %v446_v25, %v445_v24  ;;  %v448_v33 = vld [vmem:[#allocation7 + $0x58] sm:$0xff]  ;;  %p1499_p10 = pnand %p1498_p2, %p2188_p6 }
  0xa9   : > { %1227 = vmatpush3.bf16.msra.mxu0 %v1224_v8  ;;  %v421_v29 = vld [vmem:[%s1924_s2] sm:$0xff]  ;;  %v1268_v31 = vpack.c.bf16 %v630_v28, %v629_v27  ;;  %v631_v34 = vld [vmem:[#allocation8 + $0x50] sm:$0xff]  ;;  %v632_v35 = vld [vmem:[#allocation8 + $0x58] sm:$0xff]  ;;  %v1240_v36 = vpack.c.bf16 %v448_v33, %v447_v32 }
  0xaa   : > { %1259 = vmatpush3.bf16.msra.mxu1 %v1256_v12  ;;  %1229 = vmatprep.subr.bf16.mxu0 %v1228_v16  ;;  %v1272_v37 = vpack.c.bf16 %v632_v35, %v631_v34  ;;  %v449_v38 = vld [vmem:[#allocation7 + $0x60] sm:$0xff]  ;;  %v450_v39 = vld [vmem:[#allocation7 + $0x68] sm:$0xff]  ;;  %v451_v44 = vld [vmem:[#allocation7 + $0x70] sm:$0xff]  ;;  %p1500_p3 = pneg %p1499_p10 }
  0xab   : > { %1261 = vmatprep.subr.bf16.mxu1 %v1260_v17  ;;  %1196 = vmatprep.mubr.f32.mxu1 %v421_v29  ;;  %v633_v40 = vld [vmem:[#allocation8 + $0x60] sm:$0xff]  ;;  %v634_v41 = vld [vmem:[#allocation8 + $0x68] sm:$0xff]  ;;  %v1244_v42 = vpack.c.bf16 %v450_v39, %v449_v38  ;;  %v452_v45 = vld [vmem:[#allocation7 + $0x78] sm:$0xff] }
  0xac   : > { %v1276_v43 = vpack.c.bf16 %v634_v41, %v633_v40  ;;  %v635_v46 = vld [vmem:[#allocation8 + $0x70] sm:$0xff]  ;;  %v636_v47 = vld [vmem:[#allocation8 + $0x78] sm:$0xff]  ;;  %v1248_v48 = vpack.c.bf16 %v452_v45, %v451_v44  ;;  %v406_v50 = vld [vmem:[%s1916_s22 + $0x8] sm:$0xff] }
  0xad   : > { %1231 = vmatpush3.bf16.msra.mxu0 %v1228_v16  ;;  %v1280_v49 = vpack.c.bf16 %v636_v47, %v635_v46  ;;  %v422_v51 = vld [vmem:[%s1924_s2 + $0x8] sm:$0xff]  ;;  %v407_v52 = vld [vmem:[%s1916_s22 + $0x10] sm:$0xff]  ;;  %v408_v54 = vld [vmem:[%s1916_s22 + $0x18] sm:$0xff] }
  0xae   : > { %1263 = vmatpush3.bf16.msra.mxu1 %v1260_v17  ;;  %1233 = vmatprep.subr.bf16.mxu0 %v1232_v22  ;;  %v423_v53 = vld [vmem:[%s1924_s2 + $0x10] sm:$0xff]  ;;  %v424_v55 = vld [vmem:[%s1924_s2 + $0x18] sm:$0xff]  ;;  %v409_v56 = vld [vmem:[%s1916_s22 + $0x20] sm:$0xff] }
  0xaf   : > { %1265 = vmatprep.subr.bf16.mxu1 %v1264_v23  ;;  %v425_v57 = vld [vmem:[%s1924_s2 + $0x20] sm:$0xff]  ;;  %v410_v58 = vld [vmem:[%s1916_s22 + $0x28] sm:$0xff]  ;;  %v411_v60 = vld [vmem:[%s1916_s22 + $0x30] sm:$0xff] }
  0xb0   : > { %v426_v59 = vld [vmem:[%s1924_s2 + $0x28] sm:$0xff]  ;;  %v427_v61 = vld [vmem:[%s1924_s2 + $0x30] sm:$0xff]  ;;  %v412_v62 = vld [vmem:[%s1916_s22 + $0x38] sm:$0xff] }
  0xb1   : > { %1235 = vmatpush3.bf16.msra.mxu0 %v1232_v22  ;;  %v428_v63 = vld [vmem:[%s1924_s2 + $0x38] sm:$0xff]  ;;  %v413_v0 = vld [vmem:[%s1916_s22 + $0x40] sm:$0xff]  ;;  %v414_v2 = vld [vmem:[%s1916_s22 + $0x48] sm:$0xff] }
  0xb2   : > { %1267 = vmatpush3.bf16.msra.mxu1 %v1264_v23  ;;  %1237 = vmatprep.subr.bf16.mxu0 %v1236_v30  ;;  %v429_v1 = vld [vmem:[%s1924_s2 + $0x40] sm:$0xff]  ;;  %v430_v3 = vld [vmem:[%s1924_s2 + $0x48] sm:$0xff]  ;;  %v415_v4 = vld [vmem:[%s1916_s22 + $0x50] sm:$0xff] }
  0xb3   : > { %1269 = vmatprep.subr.bf16.mxu1 %v1268_v31  ;;  %v431_v5 = vld [vmem:[%s1924_s2 + $0x50] sm:$0xff]  ;;  %v416_v6 = vld [vmem:[%s1916_s22 + $0x58] sm:$0xff]  ;;  %v417_v8 = vld [vmem:[%s1916_s22 + $0x60] sm:$0xff] }
  0xb4   : > { %v432_v7 = vld [vmem:[%s1924_s2 + $0x58] sm:$0xff]  ;;  %v433_v9 = vld [vmem:[%s1924_s2 + $0x60] sm:$0xff]  ;;  %v418_v10 = vld [vmem:[%s1916_s22 + $0x68] sm:$0xff] }
  0xb5   : > { %1239 = vmatpush3.bf16.msra.mxu0 %v1236_v30  ;;  %v434_v11 = vld [vmem:[%s1924_s2 + $0x68] sm:$0xff]  ;;  %v419_v12 = vld [vmem:[%s1916_s22 + $0x70] sm:$0xff]  ;;  %v420_v14 = vld [vmem:[%s1916_s22 + $0x78] sm:$0xff]  ;;  %s1631_s22 = smov [#allocation10]  }
  0xb6   : > { %1271 = vmatpush3.bf16.msra.mxu1 %v1268_v31  ;;  %1241 = vmatprep.subr.bf16.mxu0 %v1240_v36  ;;  %v435_v13 = vld [vmem:[%s1924_s2 + $0x70] sm:$0xff]  ;;  %v436_v15 = vld [vmem:[%s1924_s2 + $0x78] sm:$0xff]  ;;  %v1973_v16 = vld [vmem:[%s2147_s3] ss:$0 sm:$0xff]  ;;  %s1501_s11 = sshll.u32 %s1631_s22, 4  ;;  %s1502_s11 = int_to_ptr.vmem [resolvable:$false] %s1501_s11 }
  0xb7   : > { %1273 = vmatprep.subr.bf16.mxu1 %v1272_v37  ;;  %v1978_v17 = vld [vmem:[%s2149_s5] ss:$0 sm:$0xff]  ;;  %s1503_s8 = scalar_lea.vmem %s1502_s11, 4096  ;;  %p1504_p4 = scmp.lt.s32.totalorder %s2051_s4, %s1502_s11 }
  0xb8   : > { %p1505_p9 = scmp.lt.s32.totalorder %s1503_s8, %s1497_s20 }
  0xb9   : > { %1243 = vmatpush3.bf16.msra.mxu0 %v1240_v36 }
  0xba   : > { %1275 = vmatpush3.bf16.msra.mxu1 %v1272_v37  ;;  %1245 = vmatprep.subr.bf16.mxu0 %v1244_v42  ;;  %p1506_p5 = por %p1505_p9, %p1504_p4 }
  0xbb   : > { %1277 = vmatprep.subr.bf16.mxu1 %v1276_v43 }
  0xbc   : > { %p1507_p7 = pnand %p1506_p5, %p1500_p3 }
  0xbd   : > { %1247 = vmatpush3.bf16.msra.mxu0 %v1244_v42 }
  0xbe   : > { %1279 = vmatpush3.bf16.msra.mxu1 %v1276_v43  ;;  %1249 = vmatprep.subr.bf16.mxu0 %v1248_v48 }
  0xbf   : > { %1281 = vmatprep.subr.bf16.mxu1 %v1280_v49 }
  0xc1   : > { %1251 = vmatpush3.bf16.msra.mxu0 %v1248_v48 }
  0xc2   : > { %1283 = vmatpush3.bf16.msra.mxu1 %v1280_v49 }
  0xc4   : > { %1141 = vmatmul.mubr.f32.vlgmr.msra.gmra.mrb[0].mxu0 %v406_v50 }
  0xc5   : > { %1197 = vmatmul.mubr.f32.vlgmr.msra.gmra.mrb[0].mxu1 %v422_v51  ;;  %1143 = vmatprep.mubr.f32.mxu0 %v407_v52 }
  0xc6   : > { %1199 = vmatprep.mubr.f32.mxu1 %v423_v53 }
  0xc8   : > { %1144 = vmatmul.mubr.f32.gmra.mrb[2].mxu0 %v408_v54 }
  0xc9   : > { %1200 = vmatmul.mubr.f32.gmra.mrb[2].mxu1 %v424_v55  ;;  %1146 = vmatprep.mubr.f32.mxu0 %v409_v56 }
  0xca   : > { %1202 = vmatprep.mubr.f32.mxu1 %v425_v57 }
  0xcc   : > { %1147 = vmatmul.mubr.f32.gmra.mrb[4].mxu0 %v410_v58 }
  0xcd   : > { %1203 = vmatmul.mubr.f32.gmra.mrb[4].mxu1 %v426_v59  ;;  %1149 = vmatprep.mubr.f32.mxu0 %v411_v60 }
  0xce   : > { %1205 = vmatprep.mubr.f32.mxu1 %v427_v61 }
  0xd0   : > { %1150 = vmatmul.mubr.f32.gmra.mrb[6].mxu0 %v412_v62 }
  0xd1   : > { %1206 = vmatmul.mubr.f32.gmra.mrb[6].mxu1 %v428_v63  ;;  %1152 = vmatprep.mubr.f32.mxu0 %v413_v0 }
  0xd2   : > { %1208 = vmatprep.mubr.f32.mxu1 %v429_v1 }
  0xd4   : > { %1153 = vmatmul.mubr.f32.gmra.mrb[8].mxu0 %v414_v2 }
  0xd5   : > { %1209 = vmatmul.mubr.f32.gmra.mrb[8].mxu1 %v430_v3  ;;  %1155 = vmatprep.mubr.f32.mxu0 %v415_v4 }
  0xd6   : > { %1211 = vmatprep.mubr.f32.mxu1 %v431_v5 }
  0xd8   : > { %1156 = vmatmul.mubr.f32.gmra.mrb[10].mxu0 %v416_v6 }
  0xd9   : > { %1212 = vmatmul.mubr.f32.gmra.mrb[10].mxu1 %v432_v7  ;;  %1158 = vmatprep.mubr.f32.mxu0 %v417_v8 }
  0xda   : > { %1214 = vmatprep.mubr.f32.mxu1 %v433_v9 }
  0xdc   : > { %1159 = vmatmul.mubr.f32.gmra.mrb[12].mxu0 %v418_v10 }
  0xdd   : > { %1215 = vmatmul.mubr.f32.gmra.mrb[12].mxu1 %v434_v11  ;;  %1161 = vmatprep.mubr.f32.mxu0 %v419_v12 }
  0xde   : > { %1217 = vmatprep.mubr.f32.mxu1 %v435_v13 }
  0xe0   : > { %1162 = vmatmul.mubr.f32.gmra.mrb[14].mxu0 %v420_v14 }
  0xe1   : > { %1218 = vmatmul.mubr.f32.gmra.mrb[14].mxu1 %v436_v15 }
 0x197   : > { %v1142_v18 = vpop.f32.mrb[0].mxu0 }
 0x198   : > { %v532_v19 = vadd.f32 %v1142_v18, %v1973_v16  ;;  %v1198_v20 = vpop.f32.mrb[0].mxu1  ;;  %v526_v21 = vpop.f32.mrb[1].mxu0 }
 0x199   : > { %v716_v22 = vadd.f32 %v1198_v20, %v1978_v17  ;;  %v527_v23 = vadd.f32 %v1973_v16, %v526_v21  ;;  %v710_v24 = vpop.f32.mrb[1].mxu1 }
 0x19a   : > { %606 = vst [vmem:[%s1984_s18 + $0x8] sm:$0xff] %v532_v19  ;;  %v711_v25 = vadd.f32 %v1978_v17, %v710_v24 }
 0x19b   : > { %790 = vst [vmem:[%s1989_s17 + $0x8] sm:$0xff] %v716_v22  ;;  %605 = vst [vmem:[%s1984_s18] sm:$0xff] %v527_v23  ;;  %v1145_v26 = vpop.f32.mrb[2].mxu0 }
 0x19c   : > { %789 = vst [vmem:[%s1989_s17] sm:$0xff] %v711_v25  ;;  %v542_v27 = vadd.f32 %v1145_v26, %v1973_v16  ;;  %v1201_v28 = vpop.f32.mrb[2].mxu1  ;;  %v536_v29 = vpop.f32.mrb[3].mxu0 }
 0x19d   : > { %v726_v30 = vadd.f32 %v1201_v28, %v1978_v17  ;;  %v537_v31 = vadd.f32 %v1973_v16, %v536_v29  ;;  %v720_v32 = vpop.f32.mrb[3].mxu1 }
 0x19e   : > { %608 = vst [vmem:[%s1984_s18 + $0x18] sm:$0xff] %v542_v27  ;;  %v721_v33 = vadd.f32 %v1978_v17, %v720_v32 }
 0x19f   : > { %792 = vst [vmem:[%s1989_s17 + $0x18] sm:$0xff] %v726_v30  ;;  %607 = vst [vmem:[%s1984_s18 + $0x10] sm:$0xff] %v537_v31  ;;  %v1148_v34 = vpop.f32.mrb[4].mxu0 }
 0x1a0   : > { %791 = vst [vmem:[%s1989_s17 + $0x10] sm:$0xff] %v721_v33  ;;  %v552_v35 = vadd.f32 %v1148_v34, %v1973_v16  ;;  %v1204_v36 = vpop.f32.mrb[4].mxu1  ;;  %v546_v37 = vpop.f32.mrb[5].mxu0 }
 0x1a1   : > { %v736_v38 = vadd.f32 %v1204_v36, %v1978_v17  ;;  %v547_v39 = vadd.f32 %v1973_v16, %v546_v37  ;;  %v730_v40 = vpop.f32.mrb[5].mxu1 }
 0x1a2   : > { %610 = vst [vmem:[%s1984_s18 + $0x28] sm:$0xff] %v552_v35  ;;  %v731_v41 = vadd.f32 %v1978_v17, %v730_v40 }
 0x1a3   : > { %794 = vst [vmem:[%s1989_s17 + $0x28] sm:$0xff] %v736_v38  ;;  %609 = vst [vmem:[%s1984_s18 + $0x20] sm:$0xff] %v547_v39  ;;  %v1151_v42 = vpop.f32.mrb[6].mxu0 }
 0x1a4   : > { %793 = vst [vmem:[%s1989_s17 + $0x20] sm:$0xff] %v731_v41  ;;  %v562_v43 = vadd.f32 %v1151_v42, %v1973_v16  ;;  %v1207_v44 = vpop.f32.mrb[6].mxu1  ;;  %v556_v45 = vpop.f32.mrb[7].mxu0 }
 0x1a5   : > { %v746_v46 = vadd.f32 %v1207_v44, %v1978_v17  ;;  %v557_v47 = vadd.f32 %v1973_v16, %v556_v45  ;;  %v740_v48 = vpop.f32.mrb[7].mxu1 }
 0x1a6   : > { %612 = vst [vmem:[%s1984_s18 + $0x38] sm:$0xff] %v562_v43  ;;  %v741_v49 = vadd.f32 %v1978_v17, %v740_v48 }
 0x1a7   : > { %796 = vst [vmem:[%s1989_s17 + $0x38] sm:$0xff] %v746_v46  ;;  %611 = vst [vmem:[%s1984_s18 + $0x30] sm:$0xff] %v557_v47  ;;  %v1154_v50 = vpop.f32.mrb[8].mxu0 }
 0x1a8   : > { %795 = vst [vmem:[%s1989_s17 + $0x30] sm:$0xff] %v741_v49  ;;  %v572_v51 = vadd.f32 %v1154_v50, %v1973_v16  ;;  %v1210_v52 = vpop.f32.mrb[8].mxu1  ;;  %v566_v53 = vpop.f32.mrb[9].mxu0 }
 0x1a9   : > { %v756_v54 = vadd.f32 %v1210_v52, %v1978_v17  ;;  %v567_v55 = vadd.f32 %v1973_v16, %v566_v53  ;;  %v750_v56 = vpop.f32.mrb[9].mxu1 }
 0x1aa   : > { %614 = vst [vmem:[%s1984_s18 + $0x48] sm:$0xff] %v572_v51  ;;  %v751_v57 = vadd.f32 %v1978_v17, %v750_v56 }
 0x1ab   : > { %798 = vst [vmem:[%s1989_s17 + $0x48] sm:$0xff] %v756_v54  ;;  %613 = vst [vmem:[%s1984_s18 + $0x40] sm:$0xff] %v567_v55  ;;  %v1157_v58 = vpop.f32.mrb[10].mxu0 }
 0x1ac   : > { %797 = vst [vmem:[%s1989_s17 + $0x40] sm:$0xff] %v751_v57  ;;  %v582_v59 = vadd.f32 %v1157_v58, %v1973_v16  ;;  %v1213_v60 = vpop.f32.mrb[10].mxu1  ;;  %v576_v61 = vpop.f32.mrb[11].mxu0 }
 0x1ad   : > { %v766_v62 = vadd.f32 %v1213_v60, %v1978_v17  ;;  %v577_v63 = vadd.f32 %v1973_v16, %v576_v61  ;;  %v760_v0 = vpop.f32.mrb[11].mxu1 }
 0x1ae   : > { %616 = vst [vmem:[%s1984_s18 + $0x58] sm:$0xff] %v582_v59  ;;  %v761_v1 = vadd.f32 %v1978_v17, %v760_v0 }
 0x1af   : > { %800 = vst [vmem:[%s1989_s17 + $0x58] sm:$0xff] %v766_v62  ;;  %615 = vst [vmem:[%s1984_s18 + $0x50] sm:$0xff] %v577_v63  ;;  %v1160_v2 = vpop.f32.mrb[12].mxu0 }
 0x1b0   : > { %799 = vst [vmem:[%s1989_s17 + $0x50] sm:$0xff] %v761_v1  ;;  %v592_v3 = vadd.f32 %v1160_v2, %v1973_v16  ;;  %v1216_v4 = vpop.f32.mrb[12].mxu1  ;;  %v586_v5 = vpop.f32.mrb[13].mxu0 }
 0x1b1   : > { %v776_v6 = vadd.f32 %v1216_v4, %v1978_v17  ;;  %v587_v7 = vadd.f32 %v1973_v16, %v586_v5  ;;  %v770_v8 = vpop.f32.mrb[13].mxu1 }
 0x1b2   : > { %618 = vst [vmem:[%s1984_s18 + $0x68] sm:$0xff] %v592_v3  ;;  %v771_v9 = vadd.f32 %v1978_v17, %v770_v8 }
 0x1b3   : > { %802 = vst [vmem:[%s1989_s17 + $0x68] sm:$0xff] %v776_v6  ;;  %617 = vst [vmem:[%s1984_s18 + $0x60] sm:$0xff] %v587_v7  ;;  %v1163_v10 = vpop.f32.mrb[14].mxu0 }
 0x1b4   : > { %801 = vst [vmem:[%s1989_s17 + $0x60] sm:$0xff] %v771_v9  ;;  %v602_v11 = vadd.f32 %v1163_v10, %v1973_v16  ;;  %v1219_v12 = vpop.f32.mrb[14].mxu1  ;;  %v596_v13 = vpop.f32.mrb[15].mxu0 }
 0x1b5   : > { %v786_v14 = vadd.f32 %v1219_v12, %v1978_v17  ;;  %v597_v15 = vadd.f32 %v1973_v16, %v596_v13  ;;  %v780_v18 = vpop.f32.mrb[15].mxu1 }
 0x1b6   : > { %620 = vst [vmem:[%s1984_s18 + $0x78] sm:$0xff] %v602_v11  ;;  %v781_v19 = vadd.f32 %v1978_v17, %v780_v18 }
 0x1b7   : > { %804 = vst [vmem:[%s1989_s17 + $0x78] sm:$0xff] %v786_v14  ;;  %619 = vst [vmem:[%s1984_s18 + $0x70] sm:$0xff] %v597_v15 }
 0x1b8   : > { %803 = vst [vmem:[%s1989_s17 + $0x70] sm:$0xff] %v781_v19 }
 0x1b9   : > { %1510 = shalt.err (!%p1507_p7)
}
 0x1ba   : > { %s1511_s2 = scalar_lea.hbm %s2046_s12, 2048  ;;  %s1515_s14 = scalar_lea.hbm %s2150_s6, 4096 }
 0x1bb   : > { %p1512_p12 = scmp.ne.s32.totalorder %s2046_s12, %s1511_s2  ;;  %p1516_p11 = scmp.lt.u32.totalorder %s2046_s12, %s2150_s6 }
 0x1bc   : > { %p1517_p13 = scmp.lt.u32.totalorder %s1515_s14, %s1511_s2  ;;  %p1519_p2 = scmp.lt.u32.totalorder %s1511_s2, %s2046_s12 }
 0x1bd   : > { %p1513_p1 = pnand %p1512_p12, %p2188_p6 }
 0x1be   : > { %p1518_p0 = por %p1517_p13, %p1516_p11 }
 0x1bf   : > { %p1514_p8 = pneg %p1513_p1 }
 0x1c0   : > { %p1520_p10 = por %p1519_p2, %p1518_p0 }
 0x1c2   : > { %p1521_p3 = pnand %p1520_p10, %p1514_p8 }
 0x1c4   : > { %1524 = shalt.err (!%p1521_p3)
}
 0x1c5   : > { %s1632_s17 = smov 128   ;;  %s1633_s15 = smov 8  }
 0x1c6   : > { %1296 = dma.vmem_to_hbm [thread:$0]  (%p2188_p6), %s2051_s4, 2048, %s2046_s12, %s806_s13, %s1632_s17, %s1632_s17, %s1633_s15  }
 0x1c7   : > { %s811_s21 = scalar_lea.sflag [#allocation12], %s1909_s26  ;;  %s1525_s28 = scalar_lea.vmem %s2062_s27, 2048 }
 0x1c8   : > { %p1526_p4 = scmp.ne.s32.totalorder %s2062_s27, %s1525_s28  ;;  %s1634_s16 = smov [#allocation11]  }
 0x1c9   : > { %s1529_s10 = sshll.u32 %s1634_s16, 4  ;;  %s1530_s10 = int_to_ptr.vmem [resolvable:$false] %s1529_s10 }
 0x1ca   : > { %p1527_p9 = pnand %p1526_p4, %p2188_p6  ;;  %s1531_s20 = scalar_lea.vmem %s1530_s10, 4096 }
 0x1cb   : > { %p1532_p7 = scmp.lt.s32.totalorder %s2062_s27, %s1530_s10  ;;  %p1533_p12 = scmp.lt.s32.totalorder %s1531_s20, %s1525_s28 }
 0x1cc   : > { %p1528_p5 = pneg %p1527_p9 }
 0x1cd   : > { %p1534_p1 = por %p1533_p12, %p1532_p7 }
 0x1cf   : > { %p1535_p8 = pnand %p1534_p1, %p1528_p5 }
 0x1d1   : > { %1538 = shalt.err (!%p1535_p8)
}
 0x1d2   : > { %s1539_s4 = scalar_lea.hbm %s2060_s0, 2048  ;;  %s1543_s22 = scalar_lea.hbm %s2151_s7, 4096 }
 0x1d3   : > { %p1540_p11 = scmp.ne.s32.totalorder %s2060_s0, %s1539_s4  ;;  %p1544_p2 = scmp.lt.u32.totalorder %s2060_s0, %s2151_s7 }
 0x1d4   : > { %p1545_p10 = scmp.lt.u32.totalorder %s1543_s22, %s1539_s4  ;;  %p1547_p4 = scmp.lt.u32.totalorder %s1539_s4, %s2060_s0 }
 0x1d5   : > { %p1541_p13 = pnand %p1540_p11, %p2188_p6 }
 0x1d6   : > { %p1546_p3 = por %p1545_p10, %p1544_p2 }
 0x1d7   : > { %p1542_p0 = pneg %p1541_p13 }
 0x1d8   : > { %p1548_p9 = por %p1547_p4, %p1546_p3 }
 0x1da   : > { %p1549_p5 = pnand %p1548_p9, %p1542_p0 }
 0x1dc   : > { %1552 = shalt.err (!%p1549_p5)
}
 0x1dd   : > { %1297 = dma.vmem_to_hbm [thread:$0]  (%p2188_p6), %s2062_s27, 2048, %s2060_s0, %s811_s21, %s1632_s17, %s1632_s17, %s1633_s15  }
 0x1de PF: > { %s2189_s2 = sld [smem:[#allocation21_spill]]  ;;  %s859_s30 = sand.u32 1, %s1603_s24  }
 0x1df   : > { %p2191_p12 = scmp.ge.s32.totalorder %s1623_s29, 2  ;;  %s860_s9 = scalar_lea.sflag [#allocation4], %s859_s30 }
 0x1e4   : > { %p2190_p7 = scmp.ne.s32.totalorder %s2189_s2, 0 }
 0x1e6   : > { %p1315_p1 = pnand %p2191_p12, %p2190_p7 }
 0x1e8   : > { %1594 = dma.done.wait (!%p1315_p1), %s860_s9, 2048  }
 0x1e9   : > { %1596 = vsyncadd (!%p1315_p1), %s860_s9, 4294965248  ;;  %s869_s19 = scalar_lea.sflag [#allocation12], %s859_s30 }
 0x1ea   : > { %1598 = dma.done.wait (!%p1315_p1), %s869_s19, 2048  }
 0x1eb   : > { %1600 = vsyncadd (!%p1315_p1), %s869_s19, 4294965248  ;;  %s31_s29 = sadd.s32 1, %s1623_s29   ;;  %s2192_s26 = sld [smem:[#allocation19_spill]] }
 0x1ec   : > { %p28_p8 = scmp.ge.s32.totalorder %s31_s29, 4   ;;  %s2193_s27 = sld [smem:[#allocation23_spill]] }
 0x1ed   : > { %s2194_s0 = sld [smem:[#allocation20_spill]]  ;;  %s2195_s28 = sld [smem:[#allocation22_spill]] }
 0x1ee   : > { %s2196_s24 = smov %s1607_s25  ;;  %30 = sbr.rel (!%p28_p8) target bundleno = 15 (0xf), region = 127 }
 0x1f1   : > { %s2197_s25 = smov %s2192_s26 }
 0x1f2   : > { %s2198_s26 = smov %s2193_s27 }
 0x1f3   : > { %s2199_s27 = smov %s2194_s0 }
 0x1f5   :  { %874 = vsyncpa [#allocation3], 1 }
 0x1f6   :  { %876 = vsyncpa [#allocation3 + $0x1], 1 }
 0x1f7   :  { %877 = vsyncpa [#allocation6], 1 }
 0x1f8   :  { %879 = vsyncpa [#allocation6 + $0x1], 1 }
 0x1f9   :  { %880 = vsyncpa [#allocation9], 1 }
 0x1fa   :  { %881 = vsyncpa [#allocation4], 1 }
 0x1fb   :  { %883 = vsyncpa [#allocation4 + $0x1], 1 }
 0x1fc   :  { %884 = vsyncpa [#allocation12], 1 }
 0x1fd   :  { %886 = vsyncpa [#allocation12 + $0x1], 1 }

</bundles_post_ra>
